<compile_context>
chip_gen: v5e
topology: v5e:2x2
jax: 0.10.0
libtpu: 0.0.40
codegen_flags: <defaults>
</compile_context>

<pallas_src>
import jax
import jax.numpy as jnp
from jax.experimental import pallas as pl
from jax.experimental.pallas import tpu as pltpu


def _make_dwconv_kernel(H, W):
    """Kernel for one row-block of (n, c) image channels.

    Refs:
      x_ref:  (RB, H*W)  input rows; flat spatial on the lane axis
      wb_ref: (RB, 10)   per-row [9 folded taps (dh-major, dw-minor), bias]
      o_ref:  (RB, H*W)
    """
    HW = H * W
    w_pow2 = (W & (W - 1)) == 0

    def kernel(x_ref, wb_ref, o_ref):
        x = x_ref[...].astype(jnp.float32)        # (RB, HW)
        wb = wb_ref[...].astype(jnp.float32)      # (RB, 10)

        pos = jax.lax.broadcasted_iota(jnp.int32, (1, HW), 1)
        col = (pos & (W - 1)) if w_pow2 else (pos % W)

        # Horizontal neighbours; left/right "same" zero padding applied ONCE.
        #   x_left[p]  = x[p-1]  (used by taps with dw = -1)
        #   x_right[p] = x[p+1]  (used by taps with dw = +1)
        x_left = jnp.where(col >= 1, pltpu.roll(x, shift=1, axis=1), 0.0)
        x_right = jnp.where(col < W - 1, pltpu.roll(x, shift=HW - 1, axis=1), 0.0)

        def row_sum(r):
            # Weighted sum of the 3 horizontal taps of kernel row r (dh = r-1).
            # (RB,1) weight columns broadcast across lanes exactly once each.
            return (wb[:, 3 * r + 0:3 * r + 1] * x_left
                    + wb[:, 3 * r + 1:3 * r + 2] * x
                    + wb[:, 3 * r + 2:3 * r + 3] * x_right)

        # dh = 0: no vertical shift, no row mask.
        acc = row_sum(1)
        # dh = -1 (kernel row 0): reads one image row above; mask first image row.
        acc = acc + jnp.where(
            pos >= W, pltpu.roll(row_sum(0), shift=W % HW, axis=1), 0.0)
        # dh = +1 (kernel row 2): reads one image row below; mask last image row.
        acc = acc + jnp.where(
            pos < (H - 1) * W,
            pltpu.roll(row_sum(2), shift=(HW - W) % HW, axis=1), 0.0)

        y = acc + wb[:, 9:10]                            # folded BatchNorm bias
        o_ref[...] = jnp.maximum(y, 0.0).astype(o_ref.dtype)   # ReLU

    return kernel


def dwconv_bn_relu(x_nchw, weight_oihw, gamma, beta, run_mean, run_var, eps=1e-5):
    """DWConv(k=3, s=1, p=1, groups=C, bias=False) + BatchNorm(inference) + ReLU.

    x_nchw:      (N, C, H, W)    native PyTorch layout (no transposes needed)
    weight_oihw: (C, 1, 3, 3)    PyTorch depthwise Conv2d weight
    """
    N, C, H, W = x_nchw.shape
    KH, KW = weight_oihw.shape[2], weight_oihw.shape[3]
    assert weight_oihw.shape[0] == C and weight_oihw.shape[1] == 1, "depthwise only"
    assert KH == 3 and KW == 3, "kernel is specialized to k=3, 'same' padding"
    # TODO(synk): generalize to other odd k (same roll/mask scheme, more taps).
    HW = H * W
    R = N * C

    # ---- tiny (C,)-sized glue: fold BN into weights, pack bias as column 10 ----
    #   conv(x, w) * scale + (beta - mean * scale) == conv(x, w * scale) + bias
    scale = gamma / jnp.sqrt(run_var + eps)                                 # (C,)
    w_folded = weight_oihw[:, 0, :, :].reshape(C, KH * KW) * scale[:, None]  # (C, 9)
    bias = (beta - run_mean * scale)[:, None]                                # (C, 1)
    wb_c = jnp.concatenate([w_folded, bias], axis=1).astype(jnp.float32)     # (C, 10)

    # ---- rows = (n, c) channels; free contiguous reshape, sublanes packed ----
    x_rows = x_nchw.reshape(R, HW)
    wb_rows = jnp.tile(wb_c, (N, 1))                     # (R, 10), negligible bytes

    # ---- row-block size: multiple of 8 sublanes, bounded by a VMEM budget ----
    # Per grid step: ~2x input + 2x output pipeline buffers + ~6 f32 temporaries.
    vmem_budget = 24 * 1024 * 1024          # working set; fits v7x 64 MiB w/ headroom
    per_row_bytes = 10 * HW * 4
    rb = max(8, (vmem_budget // per_row_bytes) // 8 * 8)
    r_pad8 = ((R + 7) // 8) * 8
    rb = min(rb, r_pad8)
    # Keep >=2 "parallel" grid steps when possible (v7x has 2 TensorCores).
    if r_pad8 // rb < 2 and rb >= 16:
        rb = max(8, (rb // 2) // 8 * 8)

    num_blocks = -(-R // rb)                # cdiv
    r_pad = num_blocks * rb
    if r_pad != R:
        x_rows = jnp.pad(x_rows, ((0, r_pad - R), (0, 0)))
        wb_rows = jnp.pad(wb_rows, ((0, r_pad - R), (0, 0)))

    # TODO(synk): if the surrounding model allows bf16 activations, pass x/out as
    # bf16 (compute stays f32 in-kernel) to halve HBM traffic (v5e is HBM-bound).
    # TODO(synk): if HW per row-block ever exceeds the VMEM budget, tile H rows
    # with a +-1-row halo via the index_map (pltpu.roll cannot see across tiles).
    out_rows = pl.pallas_call(
        _make_dwconv_kernel(H, W),
        out_shape=jax.ShapeDtypeStruct((r_pad, HW), x_nchw.dtype),
        grid_spec=pltpu.PrefetchScalarGridSpec(
            num_scalar_prefetch=0,
            grid=(num_blocks,),
            in_specs=[
                pl.BlockSpec((rb, HW), lambda i: (i, 0)),
                pl.BlockSpec((rb, KH * KW + 1), lambda i: (i, 0)),
            ],
            out_specs=pl.BlockSpec((rb, HW), lambda i: (i, 0)),
        ),
        compiler_params=pltpu.CompilerParams(
            dimension_semantics=("parallel",),
            vmem_limit_bytes=48 * 1024 * 1024,
        ),
    )(x_rows, wb_rows)

    return out_rows[:R].reshape(N, C, H, W)


def _reference(x_nchw, weight_oihw, gamma, beta, run_mean, run_var, eps=1e-5, pad=1):
    C = x_nchw.shape[1]
    y = jax.lax.conv_general_dilated(
        x_nchw.astype(jnp.float32), weight_oihw.astype(jnp.float32),
        window_strides=(1, 1), padding=((pad, pad), (pad, pad)),
        dimension_numbers=('NCHW', 'OIHW', 'NCHW'), feature_group_count=C)
    sc = (gamma / jnp.sqrt(run_var + eps))[None, :, None, None]
    bs = (beta - run_mean * gamma / jnp.sqrt(run_var + eps))[None, :, None, None]
    return jnp.maximum(y * sc + bs, 0.0)


if __name__ == "__main__":
    # DWConv(inc=4, outc=4, k=3, s=1, p=1, act='relu', bn=True, bias=False)
    N, C, H, W = 2, 4, 16, 16
    KH = KW = 3

    key = jax.random.PRNGKey(0)
    kx, kw, kg, kb, km, kv = jax.random.split(key, 6)

    x = jax.random.normal(kx, (N, C, H, W), dtype=jnp.float32)
    # PyTorch depthwise Conv2d weight shape: (outc, inc/groups=1, KH, KW); no bias.
    weight = jax.random.normal(kw, (C, 1, KH, KW), dtype=jnp.float32) * 0.2
    # BatchNorm2d parameters (inference / running-stats semantics).
    gamma = 1.0 + 0.1 * jax.random.normal(kg, (C,), dtype=jnp.float32)
    beta = 0.1 * jax.random.normal(kb, (C,), dtype=jnp.float32)
    run_mean = 0.1 * jax.random.normal(km, (C,), dtype=jnp.float32)
    run_var = 0.5 + jnp.abs(jax.random.normal(kv, (C,), dtype=jnp.float32))

    out = dwconv_bn_relu(x, weight, gamma, beta, run_mean, run_var)
    out = jax.block_until_ready(out)

    ref = _reference(x, weight, gamma, beta, run_mean, run_var)
    assert out.shape == (N, C, H, W)
    assert jnp.allclose(out, ref, atol=1e-4, rtol=1e-4), "mismatch vs reference"

    print("KERNEL_OK")
</pallas_src>

<mosaic_0001>
module attributes {stable_mosaic.version = 11 : i64} {
  func.func @kernel(%arg0: i32, %arg1: memref<8x256xf32, #tpu.memory_space<vmem>>, %arg2: memref<8x10xf32, #tpu.memory_space<vmem>>, %arg3: memref<8x256xf32, #tpu.memory_space<vmem>>) attributes {dimension_semantics = [#tpu.dimension_semantics<parallel>], iteration_bounds = array<i64: 1>, scalar_prefetch = 0 : i64, scratch_operands = 0 : i64, tpu.core_type = #tpu.core_type<tc>, window_params = [{transform_indices = @transform_0, window_bounds = array<i64: 8, 256>}, {transform_indices = @transform_1, window_bounds = array<i64: 8, 10>}, {transform_indices = @transform_2, window_bounds = array<i64: 8, 256>}]} {
    %c0 = arith.constant 0 : index
    %c0_0 = arith.constant 0 : index
    %0 = vector.load %arg1[%c0, %c0_0] : memref<8x256xf32, #tpu.memory_space<vmem>>, vector<8x256xf32>
    %c0_1 = arith.constant 0 : index
    %c0_2 = arith.constant 0 : index
    %1 = vector.load %arg2[%c0_1, %c0_2] : memref<8x10xf32, #tpu.memory_space<vmem>>, vector<8x10xf32>
    %2 = tpu.iota {dimensions = array<i32: 1>} : vector<1x256xi32>
    %c15_i32 = arith.constant 15 : i32
    %3 = vector.broadcast %c15_i32 : i32 to vector<1x256xi32>
    %4 = arith.andi %2, %3 : vector<1x256xi32>
    %c1_i32 = arith.constant 1 : i32
    %5 = vector.broadcast %c1_i32 : i32 to vector<1x256xi32>
    %6 = arith.cmpi sge, %4, %5 : vector<1x256xi32>
    %c1_i32_3 = arith.constant 1 : i32
    %7 = tpu.dynamic_rotate %0 by %c1_i32_3 dim 1 : vector<8x256xf32>, i32 -> vector<8x256xf32>
    %cst = arith.constant 0.000000e+00 : f32
    %8 = vector.shape_cast %6 : vector<1x256xi1> to vector<1x256xi1>
    %9 = vector.broadcast %8 : vector<1x256xi1> to vector<8x256xi1>
    %10 = vector.broadcast %cst : f32 to vector<8x256xf32>
    %11 = arith.select %9, %7, %10 : vector<8x256xi1>, vector<8x256xf32>
    %c15_i32_4 = arith.constant 15 : i32
    %12 = vector.broadcast %c15_i32_4 : i32 to vector<1x256xi32>
    %13 = arith.cmpi slt, %4, %12 : vector<1x256xi32>
    %c255_i32 = arith.constant 255 : i32
    %14 = tpu.dynamic_rotate %0 by %c255_i32 dim 1 : vector<8x256xf32>, i32 -> vector<8x256xf32>
    %cst_5 = arith.constant 0.000000e+00 : f32
    %15 = vector.shape_cast %13 : vector<1x256xi1> to vector<1x256xi1>
    %16 = vector.broadcast %15 : vector<1x256xi1> to vector<8x256xi1>
    %17 = vector.broadcast %cst_5 : f32 to vector<8x256xf32>
    %18 = arith.select %16, %14, %17 : vector<8x256xi1>, vector<8x256xf32>
    %19 = vector.extract_strided_slice %1 {offsets = [0, 3], sizes = [8, 1], strides = [1, 1]} : vector<8x10xf32> to vector<8x1xf32>
    %20 = vector.broadcast %19 : vector<8x1xf32> to vector<8x256xf32>
    %21 = arith.mulf %20, %11 : vector<8x256xf32>
    %22 = vector.extract_strided_slice %1 {offsets = [0, 4], sizes = [8, 1], strides = [1, 1]} : vector<8x10xf32> to vector<8x1xf32>
    %23 = vector.broadcast %22 : vector<8x1xf32> to vector<8x256xf32>
    %24 = arith.mulf %23, %0 : vector<8x256xf32>
    %25 = arith.addf %21, %24 : vector<8x256xf32>
    %26 = vector.extract_strided_slice %1 {offsets = [0, 5], sizes = [8, 1], strides = [1, 1]} : vector<8x10xf32> to vector<8x1xf32>
    %27 = vector.broadcast %26 : vector<8x1xf32> to vector<8x256xf32>
    %28 = arith.mulf %27, %18 : vector<8x256xf32>
    %29 = arith.addf %25, %28 : vector<8x256xf32>
    %c16_i32 = arith.constant 16 : i32
    %30 = vector.broadcast %c16_i32 : i32 to vector<1x256xi32>
    %31 = arith.cmpi sge, %2, %30 : vector<1x256xi32>
    %32 = vector.extract_strided_slice %1 {offsets = [0, 0], sizes = [8, 1], strides = [1, 1]} : vector<8x10xf32> to vector<8x1xf32>
    %33 = vector.broadcast %32 : vector<8x1xf32> to vector<8x256xf32>
    %34 = arith.mulf %33, %11 : vector<8x256xf32>
    %35 = vector.extract_strided_slice %1 {offsets = [0, 1], sizes = [8, 1], strides = [1, 1]} : vector<8x10xf32> to vector<8x1xf32>
    %36 = vector.broadcast %35 : vector<8x1xf32> to vector<8x256xf32>
    %37 = arith.mulf %36, %0 : vector<8x256xf32>
    %38 = arith.addf %34, %37 : vector<8x256xf32>
    %39 = vector.extract_strided_slice %1 {offsets = [0, 2], sizes = [8, 1], strides = [1, 1]} : vector<8x10xf32> to vector<8x1xf32>
    %40 = vector.broadcast %39 : vector<8x1xf32> to vector<8x256xf32>
    %41 = arith.mulf %40, %18 : vector<8x256xf32>
    %42 = arith.addf %38, %41 : vector<8x256xf32>
    %c16_i32_6 = arith.constant 16 : i32
    %43 = tpu.dynamic_rotate %42 by %c16_i32_6 dim 1 : vector<8x256xf32>, i32 -> vector<8x256xf32>
    %cst_7 = arith.constant 0.000000e+00 : f32
    %44 = vector.shape_cast %31 : vector<1x256xi1> to vector<1x256xi1>
    %45 = vector.broadcast %44 : vector<1x256xi1> to vector<8x256xi1>
    %46 = vector.broadcast %cst_7 : f32 to vector<8x256xf32>
    %47 = arith.select %45, %43, %46 : vector<8x256xi1>, vector<8x256xf32>
    %48 = arith.addf %29, %47 : vector<8x256xf32>
    %c240_i32 = arith.constant 240 : i32
    %49 = vector.broadcast %c240_i32 : i32 to vector<1x256xi32>
    %50 = arith.cmpi slt, %2, %49 : vector<1x256xi32>
    %51 = vector.extract_strided_slice %1 {offsets = [0, 6], sizes = [8, 1], strides = [1, 1]} : vector<8x10xf32> to vector<8x1xf32>
    %52 = vector.broadcast %51 : vector<8x1xf32> to vector<8x256xf32>
    %53 = arith.mulf %52, %11 : vector<8x256xf32>
    %54 = vector.extract_strided_slice %1 {offsets = [0, 7], sizes = [8, 1], strides = [1, 1]} : vector<8x10xf32> to vector<8x1xf32>
    %55 = vector.broadcast %54 : vector<8x1xf32> to vector<8x256xf32>
    %56 = arith.mulf %55, %0 : vector<8x256xf32>
    %57 = arith.addf %53, %56 : vector<8x256xf32>
    %58 = vector.extract_strided_slice %1 {offsets = [0, 8], sizes = [8, 1], strides = [1, 1]} : vector<8x10xf32> to vector<8x1xf32>
    %59 = vector.broadcast %58 : vector<8x1xf32> to vector<8x256xf32>
    %60 = arith.mulf %59, %18 : vector<8x256xf32>
    %61 = arith.addf %57, %60 : vector<8x256xf32>
    %c240_i32_8 = arith.constant 240 : i32
    %62 = tpu.dynamic_rotate %61 by %c240_i32_8 dim 1 : vector<8x256xf32>, i32 -> vector<8x256xf32>
    %cst_9 = arith.constant 0.000000e+00 : f32
    %63 = vector.shape_cast %50 : vector<1x256xi1> to vector<1x256xi1>
    %64 = vector.broadcast %63 : vector<1x256xi1> to vector<8x256xi1>
    %65 = vector.broadcast %cst_9 : f32 to vector<8x256xf32>
    %66 = arith.select %64, %62, %65 : vector<8x256xi1>, vector<8x256xf32>
    %67 = arith.addf %48, %66 : vector<8x256xf32>
    %68 = vector.extract_strided_slice %1 {offsets = [0, 9], sizes = [8, 1], strides = [1, 1]} : vector<8x10xf32> to vector<8x1xf32>
    %69 = vector.broadcast %68 : vector<8x1xf32> to vector<8x256xf32>
    %70 = arith.addf %67, %69 : vector<8x256xf32>
    %cst_10 = arith.constant 0.000000e+00 : f32
    %71 = vector.broadcast %cst_10 : f32 to vector<8x256xf32>
    %72 = arith.maximumf %70, %71 : vector<8x256xf32>
    %c0_11 = arith.constant 0 : index
    %c0_12 = arith.constant 0 : index
    %73 = vector.load %arg3[%c0_11, %c0_12] : memref<8x256xf32, #tpu.memory_space<vmem>>, vector<8x256xf32>
    tpu.vector_store %arg3[%c0_11, %c0_12], %72 {strides = array<i32>} : memref<8x256xf32, #tpu.memory_space<vmem>>, vector<8x256xf32>,
    return
  }
  func.func @transform_0(%arg0: i32) -> (i32, i32) {
    %c0_i32 = arith.constant 0 : i32
    %c0_i32_0 = arith.constant 0 : i32
    return %arg0, %c0_i32 : i32, i32
  }
  func.func @transform_1(%arg0: i32) -> (i32, i32) {
    %c0_i32 = arith.constant 0 : i32
    %c0_i32_0 = arith.constant 0 : i32
    return %arg0, %c0_i32 : i32, i32
  }
  func.func @transform_2(%arg0: i32) -> (i32, i32) {
    %c0_i32 = arith.constant 0 : i32
    %c0_i32_0 = arith.constant 0 : i32
    return %arg0, %c0_i32 : i32, i32
  }
}

</mosaic_0001>

<bundles_post_ra>
// kernel: tpu_custom_call.1
= control target key start
LH: loop header
LB: loop body
LE: loop exit
PB: predicated region body
PF: predicated region fallthrough
CT: control target
= control target key end

     0   :  { %7 = vsyncpa [#allocation3], 0  ;;  %s393_s0 = inlined_call_operand.hbm [shape: f32[8,256], index: 0, kind: input, shape index: {}]   ;;  %s394_s1 = inlined_call_operand.hbm [shape: f32[8,10], index: 1, kind: input, shape index: {}]   ;;  %s395_s2 = inlined_call_operand.hbm [shape: f32[8,256], index: 2, kind: output, shape index: {}]  }
   0x1   :  { %8 = vsyncpa [#allocation6], 0 }
   0x2   :  { %9 = vsyncpa [#allocation4], 0  ;;  %s15_s11 = sshll.u32 %s393_s0, 4  ;;  %s313_s12 = smov [#allocation2]   ;;  %s16_s11 = int_to_ptr.hbm [resolvable:$true] %s15_s11 }
   0x3   :  { %s17_s13 = sshll.u32 %s313_s12, 4  ;;  %s26_s16 = sshll.u32 %s394_s1, 4  ;;  %s18_s13 = int_to_ptr.vmem [resolvable:$true] %s17_s13  ;;  %s27_s16 = int_to_ptr.hbm [resolvable:$true] %s26_s16 }
   0x4   :  { %20 = dma.hbm_to_vmem [thread:$0]  %s16_s11, 256, %s18_s13, [#allocation3]  }
   0x5   :  { %s314_s17 = smov [#allocation5]  }
   0x6   :  { %s28_s18 = sshll.u32 %s314_s17, 4  ;;  %s29_s18 = int_to_ptr.vmem [resolvable:$true] %s28_s18 }
   0x7   :  { %31 = dma.hbm_to_vmem [thread:$0]  %s27_s16, 128, %s29_s18, [#allocation6]  }
   0x8   :  { %307 = dma.done.wait [#allocation3], 256  }
   0x9   :  { %308 = vsyncadd [#allocation3], 4294967040 }
   0xa   :  { %309 = dma.done.wait [#allocation6], 128  }
   0xb   :  { %310 = vsyncadd [#allocation6], 4294967168  ;;  %v315_v0 = vmov 0   ;;  %v316_v1 = vmov 6   ;;  %v317_v2 = vmov 2   ;;  %v351_v3 = vld [vmem:[#allocation2] sm:$0xff]  ;;  %v43_v12 = vlaneseq }
   0xc   :  { %224 = vset.pattern.permute.xlu2 %v315_v0  ;;  %227 = vset.pattern.permute.xlu1 %v316_v1  ;;  %v353_v4 = vld [vmem:[#allocation5] sm:$0xff]  ;;  %s318_s0 = smov 127   ;;  %s319_s1 = smov 1   ;;  %v358_v5 = vld [vmem:[#allocation2 + $0x8] sm:$0xff]  ;;  %v320_v6 = vmov 1   ;;  %v321_v7 = vmov 7  }
   0xd   :  { %226 = vset.pattern.permute.xlu0 %v317_v2  ;;  %65 = vrot.lane.b32.xlu1 %v351_v3, %s318_s0  ;;  %v322_v8 = vmov 8   ;;  %v323_v9 = vmov 4   ;;  %v324_v10 = vmov 3   ;;  %v325_v11 = vmov 5   ;;  %s327_s19 = smov 16   ;;  %s328_s20 = smov 112  }
   0xe   :  { %50 = vrot.lane.b32.xlu0 %v351_v3, %s319_s1  ;;  %104 = vperm.xlu2 %224, %v353_v4   ;;  %v370_v13 = vand.u32 127, %v43_v12  ;;  %v326_v16 = vmov 9   ;;  %s329_s21 = smov [#allocation7]   ;;  %s196_s25 = sshll.u32 %s395_s2, 4  ;;  %s197_s25 = int_to_ptr.hbm [resolvable:$true] %s196_s25 }
   0xf   :  { %s194_s22 = sshll.u32 %s329_s21, 4  ;;  %s195_s22 = int_to_ptr.vmem [resolvable:$true] %s194_s22 }
  0x10   :  { %v373_v15 = vadd.s32 128, %v370_v13  ;;  %v46_v19 = vand.u32 15, %v370_v13  ;;  %vm54_vm0 = vcmp.lt.s32.totalorder %v370_v13, 1  ;;  %vm69_vm3 = vcmp.lt.s32.totalorder %v370_v13, 127 }
  0x11   :  { %vm129_vm6 = vcmp.lt.s32.totalorder %v370_v13, 16  ;;  %vm101_vm7 = vcmp.ge.s32.totalorder %v370_v13, 16  ;;  %vm168_vm8 = vcmp.lt.s32.totalorder %v370_v13, 112 }
  0x12   :  { %v47_v20 = vand.u32 15, %v373_v15  ;;  %vm48_vm1 = vcmp.ge.s32.totalorder %v46_v19, 1  ;;  %vm63_vm4 = vcmp.lt.s32.totalorder %v46_v19, 15  ;;  %vm141_vm9 = vcmp.lt.s32.totalorder %v373_v15, 240 }
  0x14   :  { %vm49_vm2 = vcmp.ge.s32.totalorder %v47_v20, 1  ;;  %vm64_vm5 = vcmp.lt.s32.totalorder %v47_v20, 15 }
  0x15   :  { %67 = vrot.lane.b32.xlu1 %v358_v5, %s318_s0 }
  0x16   :  { %52 = vrot.lane.b32.xlu0 %v358_v5, %s319_s1  ;;  %225 = vset.pattern.permute.xlu2 %v320_v6 }
  0x17   :  { %110 = vperm.xlu2 %225, %v353_v4  }
  0x1d   :  { %143 = vperm.xlu1 %227, %v353_v4  }
  0x1e   :  { %118 = vperm.xlu0 %226, %v353_v4  }
  0x1f   :  { %228 = vset.pattern.permute.xlu2 %v321_v7 }
  0x20   :  { %149 = vperm.xlu2 %228, %v353_v4  }
  0x25   :  { %229 = vset.pattern.permute.xlu1 %v322_v8 }
  0x26   :  { %231 = vset.pattern.permute.xlu0 %v323_v9  ;;  %157 = vperm.xlu1 %229, %v353_v4  }
  0x27   :  { %86 = vperm.xlu0 %231, %v353_v4  }
  0x28   :  { %230 = vset.pattern.permute.xlu2 %v324_v10 }
  0x29   :  { %80 = vperm.xlu2 %230, %v353_v4  }
  0x2e   :  { %232 = vset.pattern.permute.xlu1 %v325_v11 }
  0x2f   :  { %94 = vperm.xlu1 %232, %v353_v4   ;;  %234 = vset.pattern.permute.xlu0 %v326_v16 }
  0x37   :  { %233 = vset.pattern.permute.xlu1 %v326_v16 }
  0x68   :  { %v105_v14 = vpop.permute.xlu2 %104 }
  0x71   :  { %v111_v25 = vpop.permute.xlu2 %110 }
  0x72   :  { %v113_v28 = vmul.f32 %v111_v25, %v351_v3  ;;  %v114_v29 = vmul.f32 %v111_v25, %v358_v5 }
  0x7a   :  { %v150_v44 = vpop.permute.xlu2 %149 }
  0x7b   :  { %v152_v45 = vmul.f32 %v150_v44, %v351_v3  ;;  %v153_v46 = vmul.f32 %v150_v44, %v358_v5 }
  0x7f   :  { %v66_v17 = vpop.permute.xlu1 %65 }
  0x80   :  { %v51_v18 = vpop.permute.xlu0 %50 }
  0x83   :  { %v81_v57 = vpop.permute.xlu2 %80 }
  0x87   :  { %v68_v21 = vpop.permute.xlu1 %67 }
  0x88   :  { %v53_v22 = vpop.permute.xlu0 %52  ;;  %v70_v30 = vsel %vm69_vm3, %v66_v17, %v68_v21  ;;  %v71_v31 = vsel %vm69_vm3, %v68_v21, %v66_v17 }
  0x89   :  { %v55_v23 = vsel %vm54_vm0, %v51_v18, %v53_v22  ;;  %v56_v24 = vsel %vm54_vm0, %v53_v22, %v51_v18  ;;  %v76_v34 = vsel %vm63_vm4, %v70_v30, 0.0  ;;  %v77_v35 = vsel %vm64_vm5, %v71_v31, 0.0 }
  0x8a   :  { %v61_v26 = vsel %vm48_vm1, %v56_v24, 0.0  ;;  %v62_v27 = vsel %vm49_vm2, %v55_v23, 0.0 }
  0x8b   :  { %v107_v32 = vmul.f32 %v105_v14, %v61_v26  ;;  %v108_v33 = vmul.f32 %v105_v14, %v62_v27  ;;  %v83_v60 = vmul.f32 %v81_v57, %v61_v26  ;;  %v84_v61 = vmul.f32 %v81_v57, %v62_v27 }
  0x8d   :  { %v116_v38 = vadd.f32 %v114_v29, %v108_v33  ;;  %v115_v39 = vadd.f32 %v113_v28, %v107_v32 }
  0x8f   :  { %v144_v36 = vpop.permute.xlu1 %143 }
  0x90   :  { %v119_v37 = vpop.permute.xlu0 %118  ;;  %v146_v47 = vmul.f32 %v144_v36, %v61_v26  ;;  %v147_v48 = vmul.f32 %v144_v36, %v62_v27 }
  0x91   :  { %v121_v40 = vmul.f32 %v119_v37, %v76_v34  ;;  %v122_v41 = vmul.f32 %v119_v37, %v77_v35 }
  0x92   :  { %v154_v50 = vadd.f32 %v152_v45, %v146_v47  ;;  %v155_v51 = vadd.f32 %v153_v46, %v147_v48 }
  0x93   :  { %v123_v42 = vadd.f32 %v121_v40, %v115_v39  ;;  %v124_v43 = vadd.f32 %v122_v41, %v116_v38 }
  0x95   :  { %127 = vrot.lane.b32.xlu1 %v124_v43, %s327_s19  ;;  %125 = vrot.lane.b32.xlu2 %v123_v42, %s327_s19 }
  0x98   :  { %v158_v49 = vpop.permute.xlu1 %157 }
  0x99   :  { %v160_v52 = vmul.f32 %v158_v49, %v76_v34  ;;  %v161_v53 = vmul.f32 %v158_v49, %v77_v35  ;;  %v87_v56 = vpop.permute.xlu0 %86 }
  0x9a   :  { %v89_v58 = vmul.f32 %v87_v56, %v351_v3  ;;  %v90_v59 = vmul.f32 %v87_v56, %v358_v5 }
  0x9b   :  { %v162_v54 = vadd.f32 %v160_v52, %v154_v50  ;;  %v163_v55 = vadd.f32 %v161_v53, %v155_v51 }
  0x9c   :  { %v91_v63 = vadd.f32 %v89_v58, %v83_v60  ;;  %v92_v0 = vadd.f32 %v90_v59, %v84_v61 }
  0x9d   :  { %180 = vperm.xlu1 %233, %v353_v4   ;;  %166 = vrot.lane.b32.xlu0 %v163_v55, %s328_s20 }
  0x9e   :  { %164 = vrot.lane.b32.xlu2 %v162_v54, %s328_s20 }
  0xa1   :  { %v95_v62 = vpop.permute.xlu1 %94 }
  0xa2   :  { %v97_v1 = vmul.f32 %v95_v62, %v76_v34  ;;  %v98_v2 = vmul.f32 %v95_v62, %v77_v35 }
  0xa4   :  { %v99_v6 = vadd.f32 %v97_v1, %v91_v63  ;;  %v100_v7 = vadd.f32 %v98_v2, %v92_v0 }
  0xef   :  { %v126_v8 = vpop.permute.xlu2 %125 }
  0xf8   :  { %v165_v5 = vpop.permute.xlu2 %164 }
 0x107   :  { %v128_v4 = vpop.permute.xlu1 %127 }
 0x108   :  { %v131_v9 = vsel %vm129_vm6, %v128_v4, %v126_v8  ;;  %v130_v3 = vsel %vm129_vm6, %v126_v8, %v128_v4 }
 0x109   :  { %v136_v10 = vsel %vm101_vm7, %v131_v9, 0.0  ;;  %v139_v14 = vadd.f32 %v130_v3, %v100_v7 }
 0x10a   :  { %v138_v11 = vadd.f32 %v136_v10, %v99_v6 }
 0x10f   :  { %v167_v12 = vpop.permute.xlu0 %166  ;;  %v181_v18 = vpop.permute.xlu1 %180 }
 0x110   :  { %v169_v16 = vsel %vm168_vm8, %v165_v5, %v167_v12  ;;  %v170_v17 = vsel %vm168_vm8, %v167_v12, %v165_v5 }
 0x111   :  { %v176_v19 = vsel %vm141_vm9, %v170_v17, 0.0  ;;  %v177_v20 = vadd.f32 %v169_v16, %v138_v11 }
 0x112   :  { %v178_v21 = vadd.f32 %v176_v19, %v139_v14 }
 0x113   :  { %v183_v22 = vadd.f32 %v181_v18, %v177_v20 }
 0x114   :  { %v184_v13 = vadd.f32 %v181_v18, %v178_v21 }
 0x115   :  { %v185_v23 = vmax.f32 %v183_v22, 0.0 }
 0x116   :  { %v186_v15 = vmax.f32 %v184_v13, 0.0 }
 0x117   :  { %187 = vst [vmem:[#allocation7] sm:$0xff] %v185_v23 }
 0x118   :  { %188 = vst [vmem:[#allocation7 + $0x8] sm:$0xff] %v186_v15 }
 0x119   :  { %199 = dma.vmem_to_hbm [thread:$0]  %s195_s22, 256, %s197_s25, [#allocation4]  }
 0x11a   :  { %311 = dma.done.wait [#allocation4], 256  }
 0x11b   :  { %312 = vsyncadd [#allocation4], 4294967040 }
 0x11c   :  { %204 = vsyncpa [#allocation3], 1 }
 0x11d   :  { %205 = vsyncpa [#allocation6], 1 }
 0x11e   :  { %206 = vsyncpa [#allocation4], 1 }

</bundles_post_ra>
